<compile_context>
chip_gen: v6e
topology: v6e:2x2x1
jax: 0.10.0
libtpu: 0.0.40
codegen_flags: <defaults>
</compile_context>

<pallas_src>
import jax
import jax.numpy as jnp
from jax import lax
from jax.experimental import pallas as pl
from jax.experimental.pallas import tpu as pltpu

_EPS = 1e-6  # F.pairwise_distance default eps


def _round_up(x, m):
    return ((x + m - 1) // m) * m


def _vmem_capacity_bytes():
    try:
        info = pltpu.get_tpu_info()
        cap = getattr(info, "vmem_capacity_bytes", None)
        if cap:
            return int(cap)
    except Exception:
        pass
    return 64 * 1024 * 1024  # conservative fallback (v7x per-TC VMEM)


def _make_kernel(use_cache):
    def kernel(feat_ref, lab_ref, out_ref, sums_ref, counts_ref, *rest):
        cache_ref = rest[0] if use_cache else None
        phase = pl.program_id(0)   # 0: per-class sums/counts, 1: distances
        bt = pl.program_id(1)      # batch-tile index
        num_classes = sums_ref.shape[0]
        tb = feat_ref.shape[0]

        @pl.when((phase == 0) & (bt == 0))
        def _init():
            sums_ref[...] = jnp.zeros_like(sums_ref)
            counts_ref[...] = jnp.zeros_like(counts_ref)
            out_ref[...] = jnp.zeros_like(out_ref)

        # One-hot mask in (C, tb) orientation: labels are a (1, tb) lane row,
        # broadcast-compared against a sublane iota.  Padded rows carry
        # label = -1 -> all-zero column -> no effect on sums/counts/loss.
        labels = lab_ref[...]                                          # (1, tb) int32
        class_ids = lax.broadcasted_iota(jnp.int32, (num_classes, tb), 0)
        maskT = (class_ids == labels).astype(jnp.float32)              # (C, tb)

        @pl.when(phase == 0)
        def _accumulate():
            feats = feat_ref[...]                                      # (tb, D) native dtype
            if use_cache:
                cache_ref[bt] = feats                                  # stash for phase 1
            counts_ref[...] += jnp.sum(maskT, axis=1, keepdims=True)   # (C, 1)
            sums_ref[...] += jnp.dot(maskT.astype(feats.dtype), feats,
                                     preferred_element_type=jnp.float32)  # (C, D)

        # Once, at the start of phase 1: counts -> 1/count (0 for empty classes).
        @pl.when((phase == 1) & (bt == 0))
        def _finalize_counts():
            cnt = counts_ref[...]
            counts_ref[...] = jnp.where(cnt > 0.0,
                                        1.0 / jnp.maximum(cnt, 1.0), 0.0)

        @pl.when(phase == 1)
        def _distances():
            feats_raw = cache_ref[bt] if use_cache else feat_ref[...]
            feats = feats_raw.astype(jnp.float32)
            inv_counts = counts_ref[...]                               # (C, 1) = 1/count
            w_maskT = maskT * inv_counts                               # (C, tb)
            # center_b = sums[label_b] / count[label_b]  (transpose-free gather matmul)
            center = lax.dot_general(
                w_maskT, sums_ref[...],
                dimension_numbers=(((0,), (0,)), ((), ())),
                preferred_element_type=jnp.float32)                    # (tb, D)
            diff = feats - center + _EPS                               # pairwise_distance eps
            dist = jnp.sqrt(jnp.sum(diff * diff, axis=1, keepdims=True))  # (tb, 1)
            # sum_b dist_b / count[label_b]  (empty/padded rows contribute 0)
            out_ref[...] += jnp.sum(
                jnp.dot(w_maskT, dist, preferred_element_type=jnp.float32),
                keepdims=True)                                         # (1, 1)

    return kernel


def class_consistency_loss(features, labels, num_classes, *,
                           tile_b=None, use_cache=None, vmem_limit_bytes=None):
    """features: (B, D) float32/bfloat16, labels: (B,) int -> scalar float32 loss.

    Note: bfloat16 features are streamed as bf16 (half the HBM bytes); results
    then deviate slightly from a float32 reference.
    """
    features = jnp.asarray(features)
    if features.dtype not in (jnp.float32, jnp.bfloat16):
        features = features.astype(jnp.float32)
    labels = jnp.asarray(labels, jnp.int32)
    batch, dim = features.shape
    num_classes = int(num_classes)
    fbytes = jnp.dtype(features.dtype).itemsize
    lane_dim = _round_up(dim, 128)                   # lane-padded VMEM width of a row

    cap = _vmem_capacity_bytes()                     # 128 MiB v5e/v6e, 64 MiB v7x
    budget = cap // 2                                # our allocation budget (headroom)

    # ---- batch-tile sizing: ~4-8 MiB per feature tile, lane-aligned if multi-tiled ----
    b8 = _round_up(batch, 8)
    if tile_b is None:
        tile_target = max(1 << 20, min(8 << 20, budget // 8))
        rows = max(128, tile_target // max(lane_dim * fbytes, 1))
        tile_b = b8 if rows >= b8 else max(128, (min(rows, b8) // 128) * 128)
    else:
        tile_b = int(tile_b)
        tile_b = b8 if tile_b >= b8 else max(128, _round_up(tile_b, 128))

    b_pad = _round_up(batch, tile_b)
    n_tiles = b_pad // tile_b

    # ---- VMEM accounting & single-pass feature-cache decision ----
    feat_tile_bytes = _round_up(tile_b, 8) * lane_dim * fbytes
    lab_tile_bytes = 8 * _round_up(tile_b, 128) * 4
    sums_bytes = _round_up(num_classes, 8) * lane_dim * 4
    counts_bytes = _round_up(num_classes, 8) * 128 * 4
    base_bytes = 2 * (feat_tile_bytes + lab_tile_bytes) + sums_bytes + counts_bytes + 4096
    cache_bytes = n_tiles * _round_up(tile_b, 8) * lane_dim * fbytes
    if use_cache is None:
        use_cache = (n_tiles > 1) and (base_bytes + cache_bytes <= budget)
    else:
        use_cache = bool(use_cache) and (n_tiles > 1)
    vmem_need = base_bytes + (cache_bytes if use_cache else 0)
    if vmem_limit_bytes is None:
        vmem_limit_bytes = max(32 << 20, min(cap - (16 << 20), vmem_need + (24 << 20)))

    # ---- padding (padded rows: label = -1 -> zero mask -> zero contribution) ----
    if b_pad != batch:
        features = jnp.pad(features, ((0, b_pad - batch), (0, 0)))
        labels = jnp.pad(labels, (0, b_pad - batch), constant_values=-1)
    labels_row = labels.reshape(1, b_pad)

    last = n_tiles - 1
    if use_cache:
        # Phase 1 stays on the last block -> the pipeline issues no new feature
        # DMAs; tiles are read from the VMEM cache instead (single HBM pass).
        feat_map = lambda p, i: (i * (1 - p) + last * p, 0)
    else:
        feat_map = lambda p, i: (i, 0)

    scratch = [pltpu.VMEM((num_classes, dim), jnp.float32),   # per-class sums
               pltpu.VMEM((num_classes, 1), jnp.float32)]     # counts -> 1/count
    if use_cache:
        scratch.append(pltpu.VMEM((n_tiles, tile_b, dim), features.dtype))

    cost = pl.CostEstimate(
        flops=int(4 * b_pad * num_classes * dim + 6 * b_pad * dim
                  + 2 * b_pad * num_classes),
        transcendentals=int(b_pad + num_classes),
        bytes_accessed=int((1 if use_cache else 2) * b_pad * dim * fbytes
                           + 2 * b_pad * 4 + 4),
    )

    out = pl.pallas_call(
        _make_kernel(use_cache),
        out_shape=jax.ShapeDtypeStruct((1, 1), jnp.float32),
        grid_spec=pltpu.PrefetchScalarGridSpec(
            num_scalar_prefetch=0,
            grid=(2, n_tiles),                                # (phase, batch tile)
            in_specs=[
                pl.BlockSpec((tile_b, dim), feat_map),
                pl.BlockSpec((1, tile_b), lambda p, i: (0, i)),
            ],
            out_specs=pl.BlockSpec((1, 1), lambda p, i: (0, 0)),
            scratch_shapes=scratch,
        ),
        compiler_params=pltpu.CompilerParams(
            # Both axes accumulate into shared scratch / the resident output,
            # so they must stay sequential on one TensorCore.
            dimension_semantics=("arbitrary", "arbitrary"),
            vmem_limit_bytes=int(vmem_limit_bytes),
        ),
        cost_estimate=cost,
    )(features, labels_row)
    return out[0, 0]


def _reference_loss(features, labels, num_classes):
    """Pure-JAX reference mirroring the PyTorch loops (sanity check)."""
    features = jnp.asarray(features, jnp.float32)
    loss = jnp.float32(0.0)
    for c in range(num_classes):
        m = (labels == c).astype(jnp.float32)
        cnt = m.sum()
        center = jnp.where(cnt > 0,
                           (features * m[:, None]).sum(0) / jnp.maximum(cnt, 1.0),
                           0.0)
        diff = features - center[None, :] + _EPS
        dist = jnp.sqrt(jnp.sum(diff * diff, axis=1))
        cls_mean = jnp.where(cnt > 0, (dist * m).sum() / jnp.maximum(cnt, 1.0), 0.0)
        loss = loss + cls_mean
    return loss


if __name__ == "__main__":
    # Test 1: module-default small shape (single resident tile, one HBM pass).
    num_classes, batch_size, feature_dim = 4, 8, 32
    kf, kl = jax.random.split(jax.random.PRNGKey(0))
    features = jax.random.normal(kf, (batch_size, feature_dim), dtype=jnp.float32)
    labels = jax.random.randint(kl, (batch_size,), 0, num_classes, dtype=jnp.int32)

    loss = class_consistency_loss(features, labels, num_classes)
    jax.block_until_ready(loss)
    ref = _reference_loss(features, labels, num_classes)
    assert jnp.allclose(loss, ref, rtol=1e-5, atol=1e-5), (loss, ref)

    # Test 2: multi-tile path, both with the VMEM feature cache (single HBM
    # pass) and with HBM re-streaming, forced to small 128-row tiles.
    nc2, b2, d2 = 5, 384, 16
    kf2, kl2 = jax.random.split(jax.random.PRNGKey(1))
    feats2 = jax.random.normal(kf2, (b2, d2), dtype=jnp.float32)
    labs2 = jax.random.randint(kl2, (b2,), 0, nc2, dtype=jnp.int32)
    out_cache = class_consistency_loss(feats2, labs2, nc2, tile_b=128, use_cache=True)
    out_stream = class_consistency_loss(feats2, labs2, nc2, tile_b=128, use_cache=False)
    jax.block_until_ready((out_cache, out_stream))
    ref2 = _reference_loss(feats2, labs2, nc2)
    assert jnp.allclose(out_cache, ref2, rtol=1e-4, atol=1e-4), (out_cache, ref2)
    assert jnp.allclose(out_stream, ref2, rtol=1e-4, atol=1e-4), (out_stream, ref2)

    print("KERNEL_OK")
</pallas_src>

<mosaic_0001>
module attributes {stable_mosaic.version = 11 : i64} {
  func.func @kernel(%arg0: i32, %arg1: i32, %arg2: memref<8x32xf32, #tpu.memory_space<vmem>>, %arg3: memref<1x8xi32, #tpu.memory_space<vmem>>, %arg4: memref<1x1xf32, #tpu.memory_space<vmem>>, %arg5: memref<4x32xf32, #tpu.memory_space<vmem>>, %arg6: memref<4x1xf32, #tpu.memory_space<vmem>>) attributes {dimension_semantics = [#tpu.dimension_semantics<arbitrary>, #tpu.dimension_semantics<arbitrary>], iteration_bounds = array<i64: 2, 1>, scalar_prefetch = 0 : i64, scratch_operands = 2 : i64, tpu.core_type = #tpu.core_type<tc>, window_params = [{transform_indices = @transform_0, window_bounds = array<i64: 8, 32>}, {transform_indices = @transform_1, window_bounds = array<i64: 1, 8>}, {pipeline_mode = #tpu.pipeline_mode<synchronous>, transform_indices = @transform_2, window_bounds = array<i64: 1, 1>}]} {
    %c0_i32 = arith.constant 0 : i32
    %0 = arith.cmpi eq, %arg0, %c0_i32 : i32
    %c0_i32_0 = arith.constant 0 : i32
    %1 = arith.cmpi eq, %arg1, %c0_i32_0 : i32
    %2 = arith.andi %0, %1 : i1
    %3 = arith.extui %2 : i1 to i32
    %c0_i32_1 = arith.constant 0 : i32
    %4 = arith.cmpi ne, %3, %c0_i32_1 : i32
    scf.if %4 {
      %cst = arith.constant 0.000000e+00 : f32
      %22 = vector.broadcast %cst : f32 to vector<4x32xf32>
      %c0_9 = arith.constant 0 : index
      %c0_10 = arith.constant 0 : index
      %23 = vector.load %arg5[%c0_9, %c0_10] : memref<4x32xf32, #tpu.memory_space<vmem>>, vector<4x32xf32>
      tpu.vector_store %arg5[%c0_9, %c0_10], %22 {strides = array<i32>} : memref<4x32xf32, #tpu.memory_space<vmem>>, vector<4x32xf32>,
      %cst_11 = arith.constant 0.000000e+00 : f32
      %24 = vector.broadcast %cst_11 : f32 to vector<4x1xf32>
      %c0_12 = arith.constant 0 : index
      %c0_13 = arith.constant 0 : index
      %25 = vector.load %arg6[%c0_12, %c0_13] : memref<4x1xf32, #tpu.memory_space<vmem>>, vector<4x1xf32>
      tpu.vector_store %arg6[%c0_12, %c0_13], %24 {strides = array<i32>} : memref<4x1xf32, #tpu.memory_space<vmem>>, vector<4x1xf32>,
      %cst_14 = arith.constant 0.000000e+00 : f32
      %26 = vector.broadcast %cst_14 : f32 to vector<1x1xf32>
      %c0_15 = arith.constant 0 : index
      %c0_16 = arith.constant 0 : index
      %27 = vector.load %arg4[%c0_15, %c0_16] : memref<1x1xf32, #tpu.memory_space<vmem>>, vector<1x1xf32>
      tpu.vector_store %arg4[%c0_15, %c0_16], %26 {strides = array<i32>} : memref<1x1xf32, #tpu.memory_space<vmem>>, vector<1x1xf32>,
    } else {
    }
    %c0 = arith.constant 0 : index
    %c0_2 = arith.constant 0 : index
    %5 = vector.load %arg3[%c0, %c0_2] : memref<1x8xi32, #tpu.memory_space<vmem>>, vector<1x8xi32>
    %6 = tpu.iota {dimensions = array<i32: 0>} : vector<4x8xi32>
    %7 = vector.broadcast %5 : vector<1x8xi32> to vector<4x8xi32>
    %8 = arith.cmpi eq, %6, %7 : vector<4x8xi32>
    %9 = arith.extui %8 : vector<4x8xi1> to vector<4x8xi32>
    %10 = arith.sitofp %9 : vector<4x8xi32> to vector<4x8xf32>
    %c0_i32_3 = arith.constant 0 : i32
    %11 = arith.cmpi eq, %arg0, %c0_i32_3 : i32
    %12 = arith.extui %11 : i1 to i32
    %c0_i32_4 = arith.constant 0 : i32
    %13 = arith.cmpi ne, %12, %c0_i32_4 : i32
    scf.if %13 {
      %c0_9 = arith.constant 0 : index
      %c0_10 = arith.constant 0 : index
      %22 = vector.load %arg2[%c0_9, %c0_10] : memref<8x32xf32, #tpu.memory_space<vmem>>, vector<8x32xf32>
      %c0_11 = arith.constant 0 : index
      %c0_12 = arith.constant 0 : index
      %23 = vector.load %arg6[%c0_11, %c0_12] : memref<4x1xf32, #tpu.memory_space<vmem>>, vector<4x1xf32>
      %cst = arith.constant dense<0.000000e+00> : vector<4xf32>
      %24 = vector.multi_reduction <add>, %10, %cst [1] : vector<4x8xf32> to vector<4xf32>
      %25 = vector.shape_cast %24 : vector<4xf32> to vector<4x1xf32>
      %26 = arith.addf %23, %25 : vector<4x1xf32>
      %c0_13 = arith.constant 0 : index
      %c0_14 = arith.constant 0 : index
      %27 = vector.load %arg6[%c0_13, %c0_14] : memref<4x1xf32, #tpu.memory_space<vmem>>, vector<4x1xf32>
      tpu.vector_store %arg6[%c0_13, %c0_14], %26 {strides = array<i32>} : memref<4x1xf32, #tpu.memory_space<vmem>>, vector<4x1xf32>,
      %c0_15 = arith.constant 0 : index
      %c0_16 = arith.constant 0 : index
      %28 = vector.load %arg5[%c0_15, %c0_16] : memref<4x32xf32, #tpu.memory_space<vmem>>, vector<4x32xf32>
      %cst_17 = arith.constant dense<0.000000e+00> : vector<4x32xf32>
      %29 = tpu.matmul %10, %22, %cst_17 {dimension_numbers = #tpu.dot_dimension_numbers<[1], [0], [0], [1], [0, 0, 1, 1], [], []>} : vector<4x8xf32>, vector<8x32xf32>, vector<4x32xf32> -> vector<4x32xf32>
      %30 = arith.addf %28, %29 : vector<4x32xf32>
      %c0_18 = arith.constant 0 : index
      %c0_19 = arith.constant 0 : index
      %31 = vector.load %arg5[%c0_18, %c0_19] : memref<4x32xf32, #tpu.memory_space<vmem>>, vector<4x32xf32>
      tpu.vector_store %arg5[%c0_18, %c0_19], %30 {strides = array<i32>} : memref<4x32xf32, #tpu.memory_space<vmem>>, vector<4x32xf32>,
    } else {
    }
    %c1_i32 = arith.constant 1 : i32
    %14 = arith.cmpi eq, %arg0, %c1_i32 : i32
    %c0_i32_5 = arith.constant 0 : i32
    %15 = arith.cmpi eq, %arg1, %c0_i32_5 : i32
    %16 = arith.andi %14, %15 : i1
    %17 = arith.extui %16 : i1 to i32
    %c0_i32_6 = arith.constant 0 : i32
    %18 = arith.cmpi ne, %17, %c0_i32_6 : i32
    scf.if %18 {
      %c0_9 = arith.constant 0 : index
      %c0_10 = arith.constant 0 : index
      %22 = vector.load %arg6[%c0_9, %c0_10] : memref<4x1xf32, #tpu.memory_space<vmem>>, vector<4x1xf32>
      %cst = arith.constant 0.000000e+00 : f32
      %23 = vector.broadcast %cst : f32 to vector<4x1xf32>
      %24 = arith.cmpf ogt, %22, %23 : vector<4x1xf32>
      %cst_11 = arith.constant 1.000000e+00 : f32
      %25 = vector.broadcast %cst_11 : f32 to vector<4x1xf32>
      %26 = arith.maximumf %22, %25 : vector<4x1xf32>
      %cst_12 = arith.constant 1.000000e+00 : f32
      %27 = vector.broadcast %cst_12 : f32 to vector<4x1xf32>
      %28 = arith.divf %27, %26 : vector<4x1xf32>
      %cst_13 = arith.constant 0.000000e+00 : f32
      %29 = vector.broadcast %cst_13 : f32 to vector<4x1xf32>
      %30 = arith.select %24, %28, %29 : vector<4x1xi1>, vector<4x1xf32>
      %c0_14 = arith.constant 0 : index
      %c0_15 = arith.constant 0 : index
      %31 = vector.load %arg6[%c0_14, %c0_15] : memref<4x1xf32, #tpu.memory_space<vmem>>, vector<4x1xf32>
      tpu.vector_store %arg6[%c0_14, %c0_15], %30 {strides = array<i32>} : memref<4x1xf32, #tpu.memory_space<vmem>>, vector<4x1xf32>,
    } else {
    }
    %c1_i32_7 = arith.constant 1 : i32
    %19 = arith.cmpi eq, %arg0, %c1_i32_7 : i32
    %20 = arith.extui %19 : i1 to i32
    %c0_i32_8 = arith.constant 0 : i32
    %21 = arith.cmpi ne, %20, %c0_i32_8 : i32
    scf.if %21 {
      %c0_9 = arith.constant 0 : index
      %c0_10 = arith.constant 0 : index
      %22 = vector.load %arg2[%c0_9, %c0_10] : memref<8x32xf32, #tpu.memory_space<vmem>>, vector<8x32xf32>
      %c0_11 = arith.constant 0 : index
      %c0_12 = arith.constant 0 : index
      %23 = vector.load %arg6[%c0_11, %c0_12] : memref<4x1xf32, #tpu.memory_space<vmem>>, vector<4x1xf32>
      %24 = vector.broadcast %23 : vector<4x1xf32> to vector<4x8xf32>
      %25 = arith.mulf %10, %24 : vector<4x8xf32>
      %c0_13 = arith.constant 0 : index
      %c0_14 = arith.constant 0 : index
      %26 = vector.load %arg5[%c0_13, %c0_14] : memref<4x32xf32, #tpu.memory_space<vmem>>, vector<4x32xf32>
      %cst = arith.constant dense<0.000000e+00> : vector<8x32xf32>
      %27 = tpu.matmul %25, %26, %cst {dimension_numbers = #tpu.dot_dimension_numbers<[0], [0], [1], [1], [0, 1, 1, 1], [], []>} : vector<4x8xf32>, vector<4x32xf32>, vector<8x32xf32> -> vector<8x32xf32>
      %28 = arith.subf %22, %27 : vector<8x32xf32>
      %cst_15 = arith.constant 9.99999997E-7 : f32
      %29 = vector.broadcast %cst_15 : f32 to vector<8x32xf32>
      %30 = arith.addf %28, %29 : vector<8x32xf32>
      %31 = arith.mulf %30, %30 : vector<8x32xf32>
      %cst_16 = arith.constant dense<0.000000e+00> : vector<8xf32>
      %32 = vector.multi_reduction <add>, %31, %cst_16 [1] : vector<8x32xf32> to vector<8xf32>
      %33 = vector.shape_cast %32 : vector<8xf32> to vector<8x1xf32>
      %34 = math.sqrt %33 : vector<8x1xf32>
      %c0_17 = arith.constant 0 : index
      %c0_18 = arith.constant 0 : index
      %35 = vector.load %arg4[%c0_17, %c0_18] : memref<1x1xf32, #tpu.memory_space<vmem>>, vector<1x1xf32>
      %cst_19 = arith.constant dense<0.000000e+00> : vector<4x1xf32>
      %36 = tpu.matmul %25, %34, %cst_19 {dimension_numbers = #tpu.dot_dimension_numbers<[1], [0], [0], [1], [0, 0, 1, 1], [], []>} : vector<4x8xf32>, vector<8x1xf32>, vector<4x1xf32> -> vector<4x1xf32>
      %37 = vector.shape_cast %36 : vector<4x1xf32> to vector<1x4x1xf32>
      %cst_20 = arith.constant dense<0.000000e+00> : vector<1xf32>
      %38 = vector.multi_reduction <add>, %37, %cst_20 [1, 2] : vector<1x4x1xf32> to vector<1xf32>
      %39 = vector.shape_cast %38 : vector<1xf32> to vector<1x1x1xf32>
      %40 = vector.extract %39[0, 0, 0] : f32 from vector<1x1x1xf32>
      %41 = vector.broadcast %40 : f32 to vector<1x1xf32>
      %42 = arith.addf %35, %41 : vector<1x1xf32>
      %c0_21 = arith.constant 0 : index
      %c0_22 = arith.constant 0 : index
      %43 = vector.load %arg4[%c0_21, %c0_22] : memref<1x1xf32, #tpu.memory_space<vmem>>, vector<1x1xf32>
      tpu.vector_store %arg4[%c0_21, %c0_22], %42 {strides = array<i32>} : memref<1x1xf32, #tpu.memory_space<vmem>>, vector<1x1xf32>,
    } else {
    }
    return
  }
  func.func @transform_0(%arg0: i32, %arg1: i32) -> (i32, i32) {
    %c0_i32 = arith.constant 0 : i32
    %c0_i32_0 = arith.constant 0 : i32
    return %arg1, %c0_i32 : i32, i32
  }
  func.func @transform_1(%arg0: i32, %arg1: i32) -> (i32, i32) {
    %c0_i32 = arith.constant 0 : i32
    %c0_i32_0 = arith.constant 0 : i32
    return %c0_i32, %arg1 : i32, i32
  }
  func.func @transform_2(%arg0: i32, %arg1: i32) -> (i32, i32) {
    %c0_i32 = arith.constant 0 : i32
    %c0_i32_0 = arith.constant 0 : i32
    %c0_i32_1 = arith.constant 0 : i32
    return %c0_i32, %c0_i32_0 : i32, i32
  }
}

</mosaic_0001>

<bundles_post_ra>
// kernel: tpu_custom_call.1
= control target key start
LH: loop header
LB: loop body
LE: loop exit
PB: predicated region body
PF: predicated region fallthrough
CT: control target
= control target key end

     0   :  { %7 = vsyncpa [#allocation5], 0  ;;  %s858_s0 = inlined_call_operand.hbm [shape: f32[8,32], index: 0, kind: input, shape index: {}]   ;;  %s859_s1 = inlined_call_operand.vmem [shape: s32[1,8], index: 1, kind: input, shape index: {}]   ;;  %s860_s2 = inlined_call_operand.hbm [shape: f32[1,1], index: 2, kind: output, shape index: {}]  }
   0x1   :  { %8 = vsyncpa [#allocation6], 0  ;;  %s781_s9 = smov 0   ;;  %s783_s10 = smov 0  }
   0x2   :  { %s785_s11 = smov 0  }
   0x3 LB: > { %s576_s12 = sadd.s32 4294967295, %s755_s11   ;;  %s26_s13 = sadd.s32 1, %s751_s10  ;;  %s755_s11 = sphi %s785_s11, %s14_s11   ;;  %s751_s10 = sphi %s783_s10, %s865_s10   ;;  %s747_s9 = sphi %s781_s9, %s864_s9  }
   0x4   : > { %p28_p0 = scmp.ge.s32.totalorder %s26_s13, 2  ;;  %p577_p1 = scmp.ge.s32.totalorder %s755_s11, 1 }
   0x5   : > { %p104_p2 = scmp.lt.s32.totalorder %s755_s11, 3  ;;  %p808_p4 = scmp.eq.s32.totalorder %s576_s12, 0 }
   0x6   : > { %s867_s13 = smov (%p28_p0, %s26_s13), 0  ;;  %s757_s16 = smov [#allocation4]  }
   0x7   : > { %p802_p3 = pnand %p577_p1, %p104_p2  ;;  %s119_s17 = sshll.u32 %s757_s16, 4  ;;  %s120_s17 = int_to_ptr.vmem [resolvable:$true] %s119_s17 }
   0x8   : > { %s686_s18 = scalar_lea.vmem %s120_s17, 128  ;;  %p694_p11 = scmp.lt.s32.totalorder %s120_s17, %s120_s17 }
   0x9   : > { %p629_p5 = pneg %p802_p3  ;;  %p687_p8 = scmp.ne.s32.totalorder %s120_s17, %s686_s18 }
   0xa   : > { %p695_p12 = scmp.lt.s32.totalorder %s686_s18, %s686_s18 }
   0xb   : > { %p630_p6 = pnand %p808_p4, %p629_p5 }
   0xc   : > { %p696_p13 = por %p695_p12, %p694_p11 }
   0xd   : > { %p677_p7 = pneg %p630_p6 }
   0xf   : > { %p689_p9 = pnand %p687_p8, %p677_p7 }
  0x11   : > { %p690_p10 = pneg %p689_p9 }
  0x13   : > { %p697_p0 = pnand %p696_p13, %p690_p10 }
  0x15   : > { %700 = shalt.err (!%p697_p0)
}
  0x16   : > { %632 = dma.hbm_to_vmem [thread:$0]  (!%p630_p6), %s858_s0, 128, %s120_s17, [#allocation5]  }
  0x17   : > { %138 = sbr.rel (%p802_p3) target bundleno = 1292 (0x50c), region = 28 }
  0x1c   : > { %738 = dma.done.wait (%p808_p4), [#allocation5], 128  }
  0x1d   : > { %740 = vsyncadd (%p808_p4), [#allocation5], 4294967168  ;;  %p156_p1 = scmp.eq.s32.totalorder %s747_s9, 0 }
  0x1e   : > { %vm162_vm0 = vcmask (%p156_p1), 257024   ;;  %vm164_vm1 = vcmask (%p156_p1), 3072   ;;  %vm166_vm2 = vcmask (%p156_p1), 0   ;;  %v758_v0 = vmov (%p156_p1), 0.0  }
  0x1f   : > { %161 = sbr.rel (!%p156_p1) target bundleno = 36 (0x24), region = 36  ;;  %163 = vst.msk [vmem:[#allocation2] sm:$0xf] (%p156_p1), %vm162_vm0, %v758_v0 }
  0x20   : > { %165 = vst.msk [vmem:[#allocation3] sm:$0xf] (%p156_p1), %vm164_vm1, %v758_v0 }
  0x21   : > { %167 = vst.msk [vmem:[#allocation7] sm:$0x1] (%p156_p1), %vm166_vm2, %v758_v0 }
  0x24 PF: > { %v169_v1 = vlaneseq  ;;  %v583_v2 = vld [vmem:[%s859_s1] ss:$0 sm:$0xff]  ;;  %v759_v4 = vmov 0.0   ;;  %p585_p2 = scmp.ne.s32.totalorder %s747_s9, 0 }
  0x26   : > { %v170_v3 = vshrl.u32 %v169_v1, 7  ;;  %180 = sbr.rel (%p585_p2) target bundleno = 242 (0xf2), region = 40 }
  0x28   : > { %vm175_vm3 = vcmp.eq.s32.totalorder %v170_v3, %v583_v2 }
  0x29   : > { %v584_v5 = vsel %vm175_vm3, 1.0, %v759_v4 }
  0x2b   : > { %v181_v6 = vld [vmem:[#allocation4] sm:$0xff]  ;;  %vm191_vm4 = vcmask 64512   ;;  %vm183_vm5 = vcmask 60416   ;;  %v760_v7 = vmov 0.0   ;;  %vm761_vm6 = vmmov 0  }
  0x2c   : > { %604 = vmatprep.subr.mxu0 %v760_v7  ;;  %606 = vmatprep.mubr.msk.f32.mxu0 %vm761_vm6, %v760_v7  ;;  %v184_v8 = vsel %vm183_vm5, %v584_v5, 0.0  ;;  %v182_v9 = vld [vmem:[#allocation3] sm:$0xf]  ;;  %vm188_vm7 = vcmask 3072   ;;  %v190_v12 = vld [vmem:[#allocation2] sm:$0xf] }
  0x2d   : > { %605 = vmatpush3.msra.mxu0 %v181_v6  ;;  %185 = vadd.xlane.f32.xlu0 %v184_v8  ;;  %vm266_vm8 = vcmask 257024  }
  0x2e   : > { %607 = vmatmul.mubr.msk.f32.vlgmr.msra.gmra.mxu0 %vm191_vm4, %v584_v5 }
  0xb6   : > { %v186_v10 = vpop.xlane.xlu0 %185 }
  0xb7   : > { %v187_v11 = vadd.f32 %v186_v10, %v182_v9 }
  0xb9   : > { %189 = vst.msk [vmem:[#allocation3] sm:$0xf] %vm188_vm7, %v187_v11 }
  0xee   : > { %v261_v13 = vpop.f32.mrf.mxu0 }
  0xef   : > { %v265_v14 = vadd.f32 %v261_v13, %v190_v12 }
  0xf0   : > { %v608_v15 = vpop.f32.mrf.mxu0 }
  0xf1   : > { %267 = vst.msk [vmem:[#allocation2] sm:$0xf] %vm266_vm8, %v265_v14 }
  0xf2 PF: > { %p268_p3 = scmp.eq.s32.totalorder %s747_s9, 1 }
  0xf3   : > { %v273_v16 = vld [vmem:[#allocation3] sm:$0xf] (%p268_p3)  ;;  %vm279_vm10 = vcmask (%p268_p3), 3072  }
  0xf4   : > { %272 = sbr.rel (!%p268_p3) target bundleno = 262 (0x106), region = 44  ;;  %v275_v17 = vmax.f32 (%p268_p3), %v273_v16, 1.0  ;;  %vm274_vm9 = vcmp.gt.f32.partialorder (%p268_p3), %v273_v16, 0.0 }
  0xf6   : > { %670 = vrcp.f32 (%p268_p3), %v275_v17 }
 0x103   : > { %v671_v18 = vpop.eup %670 }
 0x104   : > { %v278_v19 = vsel %vm274_vm9, %v671_v18, 0.0 }
 0x105   : > { %280 = vst.msk [vmem:[#allocation3] sm:$0xf] %vm279_vm10, %v278_v19 }
 0x106 PF: > { %p588_p4 = scmp.ne.s32.totalorder %s747_s9, 1 }
 0x108   : > { %283 = sbr.rel (%p588_p4) target bundleno = 1277 (0x4fd), region = 48 }
 0x10d   : > { %v285_v20 = vld [vmem:[#allocation3] sm:$0xf]  ;;  %v292_v21 = vld [vmem:[#allocation2] sm:$0xf]  ;;  %v762_v22 = vmov 0   ;;  %v763_v23 = vmov 0.0  }
 0x10e   : > { %672 = vset.pattern.permute.xlu0 %v762_v22  ;;  %609 = vmatprep.subr.mxu0 %v763_v23  ;;  %vm329_vm11 = vcmask 1043456   ;;  %vm764_vm12 = vmmov 0   ;;  %vm325_vm13 = vcmask 31744   ;;  %v284_v27 = vld [vmem:[#allocation4] sm:$0xff]  ;;  %vm406_vm14 = vcmask 261120  }
 0x10f   : > { %288 = vperm.xlu0 %672, %v285_v20   ;;  %610 = vmatpush3.msk.msra.mxu0 %vm329_vm11, %v292_v21  ;;  %vm418_vm1 = vcmask 64512   ;;  %vm492_vm2 = vcmask 3072   ;;  %v417_v50 = vld [vmem:[#allocation7] sm:$0x1]  ;;  %vm505_vm3 = vcmask 0  }
 0x110   : > { %611 = vmatprep.mubr.msk.f32.mxu0 %vm764_vm12, %v763_v23  ;;  %614 = vmatprep.subr.mxu1 %v763_v23 }
 0x111   : > { %616 = vmatprep.mubr.msk.f32.mxu1 %vm764_vm12, %v763_v23 }
 0x18a   : > { %v289_v24 = vpop.permute.xlu0 %288 }
 0x18b   : > { %v291_v25 = vmul.f32 %v584_v5, %v289_v24 }
 0x18d   : > { %293 = vxpose.xlu0.b32.start.end [1/1] (short) (narrow) %v291_v25, 8 }
 0x209   : > { %v309_v26 = vpop.trf.xlu0 }
 0x20a   : > { %612 = vmatmul.mubr.msk.f32.vlgmr.msra.gmra.mxu0 %vm325_vm13, %v309_v26 }
 0x2ca   : > { %v399_v28 = vpop.f32.mrf.mxu0 }
 0x2cb   : > { %v403_v29 = vsub.f32 %v284_v27, %v399_v28 }
 0x2cc   : > { %v613_v30 = vpop.f32.mrf.mxu0 }
 0x2cd   : > { %v404_v31 = vadd.f32 1e-06, %v403_v29 }
 0x2cf   : > { %v405_v32 = vmul.f32 %v404_v31, %v404_v31 }
 0x2d1   : > { %v407_v33 = vsel %vm406_vm14, %v405_v32, 0.0 }
 0x2d2   : > { %408 = vadd.xlane.f32.xlu1 %v407_v33 }
 0x35b   : > { %v409_v34 = vpop.xlane.xlu1 %408 }
 0x35c   : > { %673 = vrsqrt.f32 %v409_v34  ;;  %vm412_vm15 = vcmp.eq.f32.partialorder %v409_v34, inf  ;;  %v415_v37 = vand.u32 2147483648, %v409_v34  ;;  %vm414_vm0 = vcmp.eq.f32.partialorder %v409_v34, 0.0 }
 0x369   : > { %v674_v35 = vpop.eup %673 }
 0x36a   : > { %v411_v36 = vmul.f32 %v674_v35, %v409_v34 }
 0x36c   : > { %v413_v38 = vsel %vm412_vm15, %v409_v34, %v411_v36 }
 0x36d   : > { %v416_v39 = vsel %vm414_vm0, %v415_v37, %v413_v38 }
 0x36e   : > { %615 = vmatpush3.msra.mxu1 %v416_v39 }
 0x36f   : > { %617 = vmatmul.mubr.msk.f32.vlgmr.msra.gmra.mxu1 %vm418_vm1, %v291_v25 }
 0x42f   : > { %v488_v40 = vpop.f32.mrf.mxu1 }
 0x430   : > { %v493_v41 = vsel %vm492_vm2, %v488_v40, 0.0 }
 0x431   : > { %494 = vadd.xlane.f32.xlu1 %v493_v41  ;;  %v618_v42 = vpop.f32.mrf.mxu1 }
 0x4ba   : > { %v495_v43 = vpop.xlane.xlu1 %494 }
 0x4bb   : > { %v496_v44 = vrot.slane %v495_v43, 4 }
 0x4bd   : > { %v497_v45 = vadd.f32 %v496_v44, %v495_v43 }
 0x4bf   : > { %v498_v46 = vrot.slane %v497_v45, 2 }
 0x4c1   : > { %v499_v47 = vadd.f32 %v498_v46, %v497_v45 }
 0x4c3   : > { %v500_v48 = vrot.slane %v499_v47, 1 }
 0x4c5   : > { %v501_v49 = vadd.f32 %v500_v48, %v499_v47 }
 0x4c7   : > { %619 = vpush %v501_v49 }
 0x4f8   : > { %s620_s23 = spop %619 }
 0x4f9   : > { %v503_v51 = vstv %s620_s23 }
 0x4fa   : > { %v504_v52 = vadd.f32 %v503_v51, %v417_v50 }
 0x4fc   : > { %506 = vst.msk [vmem:[#allocation7] sm:$0x1] %vm505_vm3, %v504_v52 }
 0x4fd PF: > { %p834_p5 = scmp.eq.s32.totalorder %s576_s12, 1  ;;  %s765_s25 = smov [#allocation7]  }
 0x4fe   : > { %s514_s26 = sshll.u32 %s765_s25, 4  ;;  %s515_s26 = int_to_ptr.vmem [resolvable:$true] %s514_s26 }
 0x4ff   : > { %s701_s27 = scalar_lea.vmem %s515_s26, 16  ;;  %s707_s28 = scalar_lea.vmem %s515_s26, 32 }
 0x500   : > { %p702_p6 = scmp.ne.s32.totalorder %s515_s26, %s701_s27  ;;  %p708_p9 = scmp.lt.s32.totalorder %s515_s26, %s515_s26 }
 0x501   : > { %p709_p10 = scmp.lt.s32.totalorder %s707_s28, %s701_s27 }
 0x502   : > { %p703_p7 = pnand %p702_p6, %p834_p5 }
 0x503   : > { %p710_p11 = por %p709_p10, %p708_p9 }
 0x504   : > { %p704_p8 = pneg %p703_p7 }
 0x506   : > { %p711_p12 = pnand %p710_p11, %p704_p8 }
 0x508   : > { %714 = shalt.err (!%p711_p12)
}
 0x509   : > { %626 = dma.vmem_to_hbm [thread:$0]  (%p834_p5), %s515_s26, 16, %s860_s2, [#allocation6]  }
 0x50a   : > { %742 = dma.done.wait (%p834_p5), [#allocation6], 16  }
 0x50b   : > { %744 = vsyncadd (%p834_p5), [#allocation6], 4294967280 }
 0x50c PF: > { %s14_s11 = sadd.s32 1, %s755_s11   ;;  %s864_s9 = smov %s751_s10 }
 0x50d   : > { %p11_p13 = scmp.ge.s32.totalorder %s14_s11, 4   ;;  %s865_s10 = smov %s867_s13 }
 0x50f   :  { %13 = sbr.rel (!%p11_p13) target bundleno = 3 (0x3), region = 77 }
 0x514   :  { %527 = vsyncpa [#allocation5], 1 }
 0x515   :  { %529 = vsyncpa [#allocation5 + $0x1], 1 }
 0x516   :  { %530 = vsyncpa [#allocation6], 1 }
 0x517   :  { %532 = vsyncpa [#allocation6 + $0x1], 1 }

</bundles_post_ra>
